<compile_context>
chip_gen: v5e
topology: v5e:2x2
jax: 0.10.0
libtpu: 0.0.40
codegen_flags: <defaults>
</compile_context>

<pallas_src>
import functools

import jax
import jax.numpy as jnp
from jax.experimental import pallas as pl
from jax.experimental.pallas import tpu as pltpu


def _round_up(x: int, m: int) -> int:
    return ((x + m - 1) // m) * m


def _pow_one_minus_pt(pt, beta: float):
    """(1 - pt)**beta with beta specialized at trace time (avoids general pow)."""
    one_minus = 1.0 - pt
    if beta == 1.0:
        return one_minus
    if beta == 0.0:
        return jnp.ones_like(one_minus)
    if float(beta).is_integer() and 1 < beta <= 4:
        w = one_minus
        for _ in range(int(beta) - 1):
            w = w * one_minus
        return w
    # General real beta: exp(beta * log1p(-pt)); pt -> 1 gives exp(-inf) = 0 (beta > 0).
    return jnp.exp(beta * jnp.log1p(-pt))


def _adaloss_kernel(pred_ref, tgt_ref, out_ref, m_ref, l_ref, t_ref, *,
                    beta: float, n_total: int, c_total: int,
                    tile_n: int, tile_c: int):
    i = pl.program_id(0)          # row-tile id ("parallel")
    j = pl.program_id(1)          # class-tile id ("arbitrary" reduction)
    nj = pl.num_programs(1)

    @pl.when(j == 0)
    def _init():
        m_ref[...] = jnp.full_like(m_ref, -jnp.inf)   # running max
        l_ref[...] = jnp.zeros_like(l_ref)            # running sum of exp(x - m)
        t_ref[...] = jnp.zeros_like(t_ref)            # target's raw logit

    logits = pred_ref[...].astype(jnp.float32)        # (tile_n, tile_c)
    tgt = tgt_ref[...]                                 # (tile_n, 1) int32
    tn, tc = logits.shape

    # Mask class lanes past the true C (ragged last class tile) with -inf so they
    # contribute nothing to max / sum-exp.
    col = j * tile_c + jax.lax.broadcasted_iota(jnp.int32, (tn, tc), 1)
    logits_m = jnp.where(col < c_total, logits, -jnp.inf)

    # Online softmax statistics along the class (lane) axis.
    m_old = m_ref[...]
    m_new = jnp.maximum(m_old, jnp.max(logits_m, axis=-1, keepdims=True))
    l_ref[...] = (l_ref[...] * jnp.exp(m_old - m_new)
                  + jnp.sum(jnp.exp(logits_m - m_new), axis=-1, keepdims=True))
    m_ref[...] = m_new

    # The target's logit lives in exactly one class tile; accumulate via masked reduce
    # (no (N, C) log_probs / float one-hot ever materialized).
    t_ref[...] = t_ref[...] + jnp.sum(jnp.where(col == tgt, logits, 0.0),
                                      axis=-1, keepdims=True)

    @pl.when(j == nj - 1)
    def _finalize():
        log_pt = (t_ref[...] - m_ref[...]) - jnp.log(l_ref[...])   # (tile_n, 1)
        pt = jnp.exp(log_pt)
        # Fused per-row loss: ce + ada = -log_pt * (1 + beta * (1 - pt)**beta)
        w = _pow_one_minus_pt(pt, beta)
        per_row = (-log_pt) * (1.0 + beta * w)
        # Mask rows past the true batch size (ragged last row tile); where() so padded
        # garbage (possibly NaN/inf) never leaks into the partial sum.
        row = i * tile_n + jax.lax.broadcasted_iota(jnp.int32, (tn, 1), 0)
        per_row = jnp.where(row < n_total, per_row, 0.0)
        out_ref[...] = jnp.sum(per_row).reshape(1, 1, 1)


def _vmem_capacity_bytes() -> int:
    try:
        return int(pltpu.get_tpu_info().vmem_capacity_bytes)
    except Exception:
        return 64 << 20  # conservative fallback (v7x-sized)


def _choose_tiles(n: int, c: int, itemsize: int):
    """Pick (tile_n, tile_c) from the generation's VMEM capacity."""
    vmem_cap = _vmem_capacity_bytes()
    # ~1/4 of physical VMEM for the streamed blocks + scratch:
    # ~32 MiB on 128-MiB parts (v5e/v6e), ~16 MiB on 64-MiB-per-TC v7x.
    budget = int(min(32 << 20, max(8 << 20, vmem_cap // 4)))
    per_buffer = budget // 2                      # logits are double-buffered

    c_pad = _round_up(c, 128)
    if 8 * c_pad * itemsize <= per_buffer:
        # Whole class row fits on lanes with at least 8 rows -> single class tile.
        tile_c = c
    else:
        # Vocab-scale C: split the class axis (multiple of 128 lanes per tile).
        tile_c = max(128, (per_buffer // (8 * itemsize)) // 128 * 128)
        tile_c = min(tile_c, c_pad)

    # Accurate per-row VMEM cost (lane-padded): 2x logits buffers, 2x target buffers,
    # 3x (tile_n, 1) f32 scratch columns.
    lane_c = max(_round_up(tile_c, 128), 128)
    per_row_bytes = 2 * lane_c * itemsize + 2 * 128 * 4 + 3 * 128 * 4
    rows_fit = max(8, (budget // per_row_bytes) // 8 * 8)
    tile_n = int(min(8192, rows_fit, _round_up(n, 8)))
    return tile_n, tile_c, vmem_cap


def ada_loss(predictions, targets, *, beta: float = 1.0,
             cast_logits_to_bf16: bool = False,
             tile_n: int = None, tile_c: int = None):
    """predictions: (N, C) float logits; targets: (N,) integer class ids.
    Returns scalar mean(cross_entropy) + mean(-beta*log(pt) * (1-pt)**beta).
    Note: out-of-range target ids silently contribute as if their logit were 0
    (no error like PyTorch's NLL path)."""
    n, c = predictions.shape
    if cast_logits_to_bf16 and predictions.dtype == jnp.float32:
        predictions = predictions.astype(jnp.bfloat16)  # halves the dominant HBM stream
    itemsize = jnp.dtype(predictions.dtype).itemsize

    auto_tn, auto_tc, vmem_cap = _choose_tiles(n, c, itemsize)
    tile_n = auto_tn if tile_n is None else int(tile_n)
    tile_c = auto_tc if tile_c is None else int(tile_c)
    assert tile_n % 8 == 0 and tile_n >= 8
    assert tile_c == c or tile_c % 128 == 0

    num_row_tiles = pl.cdiv(n, tile_n)
    num_cls_tiles = pl.cdiv(c, tile_c)
    grid = (num_row_tiles, num_cls_tiles)

    tgt2d = targets.astype(jnp.int32).reshape(n, 1)

    # vmem_limit from actual need (lane-padded) + headroom for Mosaic internal scratch;
    # never request close to physical VMEM (matters on 64-MiB v7x).
    lane_c = max(_round_up(tile_c, 128), 128)
    need = (2 * tile_n * lane_c * itemsize      # predictions, double-buffered
            + 2 * tile_n * 128 * 4              # targets, double-buffered (lane-padded)
            + 3 * tile_n * 128 * 4              # m / l / t scratch columns
            + 2 * 8 * 128 * 4)                  # output block
    vmem_limit = int(min(vmem_cap - (4 << 20), max(16 << 20, need + (4 << 20))))

    partials = pl.pallas_call(
        functools.partial(_adaloss_kernel, beta=float(beta), n_total=n,
                          c_total=c, tile_n=tile_n, tile_c=tile_c),
        out_shape=jax.ShapeDtypeStruct((num_row_tiles, 1, 1), jnp.float32),
        grid_spec=pltpu.PrefetchScalarGridSpec(
            num_scalar_prefetch=0,
            grid=grid,
            in_specs=[
                pl.BlockSpec((tile_n, tile_c), lambda i, j: (i, j)),
                pl.BlockSpec((tile_n, 1), lambda i, j: (i, 0)),
            ],
            out_specs=pl.BlockSpec((1, 1, 1), lambda i, j: (i, 0, 0)),
            scratch_shapes=[
                pltpu.VMEM((tile_n, 1), jnp.float32),   # running max
                pltpu.VMEM((tile_n, 1), jnp.float32),   # running sum-exp
                pltpu.VMEM((tile_n, 1), jnp.float32),   # target logit
            ],
        ),
        compiler_params=pltpu.CompilerParams(
            # Row tiles are independent partial sums -> "parallel" (2-TC split on v7x);
            # class axis carries the online-softmax reduction -> "arbitrary".
            dimension_semantics=("parallel", "arbitrary"),
            vmem_limit_bytes=vmem_limit,
        ),
    )(predictions, tgt2d)

    # Tiny final reduction over per-row-tile partials + the mean divide.
    return jnp.sum(partials) * (1.0 / n)


def _ada_loss_ref(predictions, targets, beta=1.0):
    """Pure-JAX reference mirroring the PyTorch forward."""
    log_probs = jax.nn.log_softmax(predictions.astype(jnp.float32), axis=1)
    n = predictions.shape[0]
    log_pt = log_probs[jnp.arange(n), targets]
    ce = -jnp.mean(log_pt)
    pt = jnp.exp(log_pt)
    ada = jnp.mean((-beta * log_pt) * jnp.power(1.0 - pt, beta))
    return ce + ada


if __name__ == "__main__":
    key = jax.random.PRNGKey(0)

    # --- Case 1: small module-sized shapes, auto tiling (single tile). ---
    num_classes, batch, beta = 32, 8, 1.0
    kp, kt, key = jax.random.split(key, 3)
    predictions = jax.random.normal(kp, (batch, num_classes), dtype=jnp.float32)
    targets = jax.random.randint(kt, (batch,), 0, num_classes, dtype=jnp.int32)
    loss = ada_loss(predictions, targets, beta=beta)
    jax.block_until_ready(loss)
    ref = _ada_loss_ref(predictions, targets, beta=beta)
    assert jnp.allclose(loss, ref, rtol=1e-5, atol=1e-5), (loss, ref)

    # --- Case 2: forced multi-tile grid (ragged row + ragged/multiple class tiles)
    #     to exercise the online-softmax class sweep and per-tile partial sums. ---
    n2, c2, beta2 = 50, 300, 2.0
    kp2, kt2, _ = jax.random.split(key, 3)
    preds2 = 3.0 * jax.random.normal(kp2, (n2, c2), dtype=jnp.float32)
    tgts2 = jax.random.randint(kt2, (n2,), 0, c2, dtype=jnp.int32)
    loss2 = ada_loss(preds2, tgts2, beta=beta2, tile_n=16, tile_c=128)
    jax.block_until_ready(loss2)
    ref2 = _ada_loss_ref(preds2, tgts2, beta=beta2)
    assert jnp.allclose(loss2, ref2, rtol=1e-5, atol=1e-5), (loss2, ref2)

    # TODO(synk): lane-packing (folding 128//C rows onto lanes) for tiny-C models is
    # left out; only worth it if a bundle dump shows the kernel VALU-bound after tiling.
    print("KERNEL_OK")
</pallas_src>

<mosaic_0001>
module attributes {stable_mosaic.version = 11 : i64} {
  func.func @_adaloss_kernel(%arg0: i32, %arg1: i32, %arg2: memref<8x32xf32, #tpu.memory_space<vmem>>, %arg3: memref<8x1xi32, #tpu.memory_space<vmem>>, %arg4: memref<1x1x1xf32, #tpu.memory_space<vmem>>, %arg5: memref<8x1xf32, #tpu.memory_space<vmem>>, %arg6: memref<8x1xf32, #tpu.memory_space<vmem>>, %arg7: memref<8x1xf32, #tpu.memory_space<vmem>>) attributes {dimension_semantics = [#tpu.dimension_semantics<parallel>, #tpu.dimension_semantics<arbitrary>], iteration_bounds = array<i64: 1, 1>, scalar_prefetch = 0 : i64, scratch_operands = 3 : i64, tpu.core_type = #tpu.core_type<tc>, window_params = [{transform_indices = @transform_0, window_bounds = array<i64: 8, 32>}, {transform_indices = @transform_1, window_bounds = array<i64: 8, 1>}, {transform_indices = @transform_2, window_bounds = array<i64: 1, 1, 1>}]} {
    %c0_i32 = arith.constant 0 : i32
    %0 = arith.cmpi eq, %arg1, %c0_i32 : i32
    %1 = arith.extui %0 : i1 to i32
    %c0_i32_0 = arith.constant 0 : i32
    %2 = arith.cmpi ne, %1, %c0_i32_0 : i32
    scf.if %2 {
      %cst_23 = arith.constant 0xFF800000 : f32
      %41 = vector.broadcast %cst_23 : f32 to vector<8x1xf32>
      %c0_24 = arith.constant 0 : index
      %c0_25 = arith.constant 0 : index
      %42 = vector.load %arg5[%c0_24, %c0_25] : memref<8x1xf32, #tpu.memory_space<vmem>>, vector<8x1xf32>
      tpu.vector_store %arg5[%c0_24, %c0_25], %41 {strides = array<i32>} : memref<8x1xf32, #tpu.memory_space<vmem>>, vector<8x1xf32>,
      %cst_26 = arith.constant 0.000000e+00 : f32
      %43 = vector.broadcast %cst_26 : f32 to vector<8x1xf32>
      %c0_27 = arith.constant 0 : index
      %c0_28 = arith.constant 0 : index
      %44 = vector.load %arg6[%c0_27, %c0_28] : memref<8x1xf32, #tpu.memory_space<vmem>>, vector<8x1xf32>
      tpu.vector_store %arg6[%c0_27, %c0_28], %43 {strides = array<i32>} : memref<8x1xf32, #tpu.memory_space<vmem>>, vector<8x1xf32>,
      %cst_29 = arith.constant 0.000000e+00 : f32
      %45 = vector.broadcast %cst_29 : f32 to vector<8x1xf32>
      %c0_30 = arith.constant 0 : index
      %c0_31 = arith.constant 0 : index
      %46 = vector.load %arg7[%c0_30, %c0_31] : memref<8x1xf32, #tpu.memory_space<vmem>>, vector<8x1xf32>
      tpu.vector_store %arg7[%c0_30, %c0_31], %45 {strides = array<i32>} : memref<8x1xf32, #tpu.memory_space<vmem>>, vector<8x1xf32>,
    } else {
    }
    %c0 = arith.constant 0 : index
    %c0_1 = arith.constant 0 : index
    %3 = vector.load %arg2[%c0, %c0_1] : memref<8x32xf32, #tpu.memory_space<vmem>>, vector<8x32xf32>
    %c0_2 = arith.constant 0 : index
    %c0_3 = arith.constant 0 : index
    %4 = vector.load %arg3[%c0_2, %c0_3] : memref<8x1xi32, #tpu.memory_space<vmem>>, vector<8x1xi32>
    %c32_i32 = arith.constant 32 : i32
    %5 = arith.muli %arg1, %c32_i32 : i32
    %6 = tpu.iota {dimensions = array<i32: 1>} : vector<8x32xi32>
    %7 = vector.broadcast %5 : i32 to vector<8x32xi32>
    %8 = arith.addi %7, %6 : vector<8x32xi32>
    %c32_i32_4 = arith.constant 32 : i32
    %9 = vector.broadcast %c32_i32_4 : i32 to vector<8x32xi32>
    %10 = arith.cmpi slt, %8, %9 : vector<8x32xi32>
    %cst = arith.constant 0xFF800000 : f32
    %11 = vector.broadcast %cst : f32 to vector<8x32xf32>
    %12 = arith.select %10, %3, %11 : vector<8x32xi1>, vector<8x32xf32>
    %c0_5 = arith.constant 0 : index
    %c0_6 = arith.constant 0 : index
    %13 = vector.load %arg5[%c0_5, %c0_6] : memref<8x1xf32, #tpu.memory_space<vmem>>, vector<8x1xf32>
    %cst_7 = arith.constant dense<0xFF800000> : vector<8xf32>
    %14 = vector.multi_reduction <maximumf>, %12, %cst_7 [1] : vector<8x32xf32> to vector<8xf32>
    %15 = vector.shape_cast %14 : vector<8xf32> to vector<8x1xf32>
    %16 = arith.maximumf %13, %15 : vector<8x1xf32>
    %c0_8 = arith.constant 0 : index
    %c0_9 = arith.constant 0 : index
    %17 = vector.load %arg6[%c0_8, %c0_9] : memref<8x1xf32, #tpu.memory_space<vmem>>, vector<8x1xf32>
    %18 = arith.subf %13, %16 : vector<8x1xf32>
    %19 = math.exp %18 : vector<8x1xf32>
    %20 = arith.mulf %17, %19 : vector<8x1xf32>
    %21 = vector.broadcast %16 : vector<8x1xf32> to vector<8x32xf32>
    %22 = arith.subf %12, %21 : vector<8x32xf32>
    %23 = math.exp %22 : vector<8x32xf32>
    %cst_10 = arith.constant dense<0.000000e+00> : vector<8xf32>
    %24 = vector.multi_reduction <add>, %23, %cst_10 [1] : vector<8x32xf32> to vector<8xf32>
    %25 = vector.shape_cast %24 : vector<8xf32> to vector<8x1xf32>
    %26 = arith.addf %20, %25 : vector<8x1xf32>
    %c0_11 = arith.constant 0 : index
    %c0_12 = arith.constant 0 : index
    %27 = vector.load %arg6[%c0_11, %c0_12] : memref<8x1xf32, #tpu.memory_space<vmem>>, vector<8x1xf32>
    tpu.vector_store %arg6[%c0_11, %c0_12], %26 {strides = array<i32>} : memref<8x1xf32, #tpu.memory_space<vmem>>, vector<8x1xf32>,
    %c0_13 = arith.constant 0 : index
    %c0_14 = arith.constant 0 : index
    %28 = vector.load %arg5[%c0_13, %c0_14] : memref<8x1xf32, #tpu.memory_space<vmem>>, vector<8x1xf32>
    tpu.vector_store %arg5[%c0_13, %c0_14], %16 {strides = array<i32>} : memref<8x1xf32, #tpu.memory_space<vmem>>, vector<8x1xf32>,
    %c0_15 = arith.constant 0 : index
    %c0_16 = arith.constant 0 : index
    %29 = vector.load %arg7[%c0_15, %c0_16] : memref<8x1xf32, #tpu.memory_space<vmem>>, vector<8x1xf32>
    %30 = vector.broadcast %4 : vector<8x1xi32> to vector<8x32xi32>
    %31 = arith.cmpi eq, %8, %30 : vector<8x32xi32>
    %cst_17 = arith.constant 0.000000e+00 : f32
    %32 = vector.broadcast %cst_17 : f32 to vector<8x32xf32>
    %33 = arith.select %31, %3, %32 : vector<8x32xi1>, vector<8x32xf32>
    %cst_18 = arith.constant dense<0.000000e+00> : vector<8xf32>
    %34 = vector.multi_reduction <add>, %33, %cst_18 [1] : vector<8x32xf32> to vector<8xf32>
    %35 = vector.shape_cast %34 : vector<8xf32> to vector<8x1xf32>
    %36 = arith.addf %29, %35 : vector<8x1xf32>
    %c0_19 = arith.constant 0 : index
    %c0_20 = arith.constant 0 : index
    %37 = vector.load %arg7[%c0_19, %c0_20] : memref<8x1xf32, #tpu.memory_space<vmem>>, vector<8x1xf32>
    tpu.vector_store %arg7[%c0_19, %c0_20], %36 {strides = array<i32>} : memref<8x1xf32, #tpu.memory_space<vmem>>, vector<8x1xf32>,
    %c0_i32_21 = arith.constant 0 : i32
    %38 = arith.cmpi eq, %arg1, %c0_i32_21 : i32
    %39 = arith.extui %38 : i1 to i32
    %c0_i32_22 = arith.constant 0 : i32
    %40 = arith.cmpi ne, %39, %c0_i32_22 : i32
    scf.if %40 {
      %c0_23 = arith.constant 0 : index
      %c0_24 = arith.constant 0 : index
      %41 = vector.load %arg7[%c0_23, %c0_24] : memref<8x1xf32, #tpu.memory_space<vmem>>, vector<8x1xf32>
      %c0_25 = arith.constant 0 : index
      %c0_26 = arith.constant 0 : index
      %42 = vector.load %arg5[%c0_25, %c0_26] : memref<8x1xf32, #tpu.memory_space<vmem>>, vector<8x1xf32>
      %43 = arith.subf %41, %42 : vector<8x1xf32>
      %c0_27 = arith.constant 0 : index
      %c0_28 = arith.constant 0 : index
      %44 = vector.load %arg6[%c0_27, %c0_28] : memref<8x1xf32, #tpu.memory_space<vmem>>, vector<8x1xf32>
      %45 = math.log %44 : vector<8x1xf32>
      %46 = arith.subf %43, %45 : vector<8x1xf32>
      %47 = math.exp %46 : vector<8x1xf32>
      %cst_29 = arith.constant 1.000000e+00 : f32
      %48 = vector.broadcast %cst_29 : f32 to vector<8x1xf32>
      %49 = arith.subf %48, %47 : vector<8x1xf32>
      %cst_30 = arith.constant 0.000000e+00 : f32
      %50 = vector.broadcast %cst_30 : f32 to vector<8x1xf32>
      %51 = arith.subf %50, %46 : vector<8x1xf32>
      %cst_31 = arith.constant 1.000000e+00 : f32
      %52 = vector.broadcast %cst_31 : f32 to vector<8x1xf32>
      %53 = arith.mulf %52, %49 : vector<8x1xf32>
      %cst_32 = arith.constant 1.000000e+00 : f32
      %54 = vector.broadcast %cst_32 : f32 to vector<8x1xf32>
      %55 = arith.addf %54, %53 : vector<8x1xf32>
      %56 = arith.mulf %51, %55 : vector<8x1xf32>
      %c8_i32 = arith.constant 8 : i32
      %57 = arith.muli %arg0, %c8_i32 : i32
      %58 = tpu.iota {dimensions = array<i32: 0>} : vector<8x1xi32>
      %59 = vector.broadcast %57 : i32 to vector<8x1xi32>
      %60 = arith.addi %59, %58 : vector<8x1xi32>
      %c8_i32_33 = arith.constant 8 : i32
      %61 = vector.broadcast %c8_i32_33 : i32 to vector<8x1xi32>
      %62 = arith.cmpi slt, %60, %61 : vector<8x1xi32>
      %cst_34 = arith.constant 0.000000e+00 : f32
      %63 = vector.broadcast %cst_34 : f32 to vector<8x1xf32>
      %64 = arith.select %62, %56, %63 : vector<8x1xi1>, vector<8x1xf32>
      %65 = vector.shape_cast %64 : vector<8x1xf32> to vector<1x8x1xf32>
      %cst_35 = arith.constant dense<0.000000e+00> : vector<1xf32>
      %66 = vector.multi_reduction <add>, %65, %cst_35 [1, 2] : vector<1x8x1xf32> to vector<1xf32>
      %67 = vector.shape_cast %66 : vector<1xf32> to vector<1x1x1xf32>
      %68 = vector.extract %67[0, 0, 0] : f32 from vector<1x1x1xf32>
      %69 = vector.broadcast %68 : f32 to vector<1x1x1xf32>
      %c0_36 = arith.constant 0 : index
      %c0_37 = arith.constant 0 : index
      %c0_38 = arith.constant 0 : index
      %70 = vector.load %arg4[%c0_36, %c0_37, %c0_38] : memref<1x1x1xf32, #tpu.memory_space<vmem>>, vector<1x1x1xf32>
      tpu.vector_store %arg4[%c0_36, %c0_37, %c0_38], %69 {strides = array<i32>} : memref<1x1x1xf32, #tpu.memory_space<vmem>>, vector<1x1x1xf32>,
    } else {
    }
    return
  }
  func.func @transform_0(%arg0: i32, %arg1: i32) -> (i32, i32) {
    %c0_i32 = arith.constant 0 : i32
    return %arg0, %arg1 : i32, i32
  }
  func.func @transform_1(%arg0: i32, %arg1: i32) -> (i32, i32) {
    %c0_i32 = arith.constant 0 : i32
    %c0_i32_0 = arith.constant 0 : i32
    return %arg0, %c0_i32 : i32, i32
  }
  func.func @transform_2(%arg0: i32, %arg1: i32) -> (i32, i32, i32) {
    %c0_i32 = arith.constant 0 : i32
    %c0_i32_0 = arith.constant 0 : i32
    %c0_i32_1 = arith.constant 0 : i32
    return %arg0, %c0_i32, %c0_i32_0 : i32, i32, i32
  }
}

</mosaic_0001>

<bundles_post_ra>
// kernel: tpu_custom_call.1
= control target key start
LH: loop header
LB: loop body
LE: loop exit
PB: predicated region body
PF: predicated region fallthrough
CT: control target
= control target key end

     0   :  { %v23_v1 = vlaneseq  ;;  %s198_s0 = inlined_call_operand.vmem [shape: f32[8,32], index: 0, kind: input, shape index: {}]   ;;  %s199_s1 = inlined_call_operand.vmem [shape: s32[8,1], index: 1, kind: input, shape index: {}]   ;;  %s200_s2 = inlined_call_operand.hbm [shape: f32[1,1,1], index: 2, kind: output, shape index: {}]  }
   0x1   :  { %v21_v0 = vld [vmem:[%s199_s1] sm:$0xff] }
   0x2   :  { %7 = vsyncpa [#allocation6], 0  ;;  %v160_v2 = vmov 0   ;;  %v20_v3 = vld [vmem:[%s198_s0] sm:$0xff]  ;;  %v24_v4 = vand.u32 127, %v23_v1  ;;  %vm30_vm0 = vcmask 261120  }
   0x3   :  { %125 = vset.pattern.permute.xlu1 %v160_v2  ;;  %124 = vset.pattern.permute.xlu0 %v160_v2  ;;  %vm16_vm2 = vcmask 7168   ;;  %v161_v7 = vmov -inf   ;;  %v162_v8 = vmov 0.0   ;;  %s163_s0 = smov [#allocation5]   ;;  %s109_s15 = sshll.u32 %s200_s2, 4  ;;  %vm100_vm4 = vcmask 0   ;;  %s110_s15 = int_to_ptr.hbm [resolvable:$true] %s109_s15 }
   0x4   :  { %57 = vperm.xlu1 %125, %v21_v0   ;;  %vm27_vm1 = vcmp.lt.s32.totalorder %v24_v4, 32  ;;  %17 = vst.msk [vmem:[#allocation2] sm:$0xff] %vm16_vm2, %v161_v7  ;;  %s107_s1 = sshll.u32 %s163_s0, 4  ;;  %s108_s1 = int_to_ptr.vmem [resolvable:$true] %s107_s1 }
   0x5   :  { %v28_v5 = vsel %vm27_vm1, %v20_v3, -inf  ;;  %19 = vst.msk [vmem:[#allocation4] sm:$0xff] %vm16_vm2, %v162_v8 }
   0x6   :  { %v31_v6 = vsel %vm30_vm0, %v28_v5, -inf  ;;  %18 = vst.msk [vmem:[#allocation3] sm:$0xff] %vm16_vm2, %v162_v8 }
   0x7   :  { %32 = vmax.xlane.f32.xlu0 %v31_v6 }
   0xb   :  { %v29_v12 = vld [vmem:[#allocation2] sm:$0xff] }
   0xc   :  { %v55_v16 = vld [vmem:[#allocation4] sm:$0xff] }
   0xd   :  { %v35_v26 = vld [vmem:[#allocation3] sm:$0xff] }
  0x76   :  { %v58_v9 = vpop.permute.xlu1 %57 }
  0x77   :  { %vm59_vm3 = vcmp.eq.s32.totalorder %v24_v4, %v58_v9 }
  0x78   :  { %v60_v10 = vsel %vm59_vm3, %v20_v3, 0.0 }
  0x79   :  { %v61_v11 = vsel %vm30_vm0, %v60_v10, 0.0 }
  0x7a   :  { %62 = vadd.xlane.f32.xlu2 %v61_v11  ;;  %v33_v13 = vpop.xlane.xlu0 %32 }
  0x7b   :  { %v34_v14 = vmax.f32 %v29_v12, %v33_v13 }
  0x7d   :  { %v36_v15 = vsub.f32 %v29_v12, %v34_v14  ;;  %54 = vst.msk [vmem:[#allocation2] sm:$0xff] %vm16_vm2, %v34_v14  ;;  %42 = vperm.xlu0 %124, %v34_v14  }
  0x7f   :  { %v37_v24 = vmul.f32 1.442695, %v36_v15 }
  0x84   :  { %v70_v33 = vld [vmem:[#allocation2] sm:$0xff] }
  0xed   :  { %v63_v17 = vpop.xlane.xlu2 %62 }
  0xee   :  { %v64_v18 = vadd.f32 %v63_v17, %v55_v16 }
  0xef   :  { %v43_v19 = vpop.permute.xlu0 %42 }
  0xf0   :  { %65 = vst.msk [vmem:[#allocation4] sm:$0xff] %vm16_vm2, %v64_v18  ;;  %v45_v20 = vsub.f32 %v28_v5, %v43_v19 }
  0xf2   :  { %v46_v21 = vmul.f32 1.442695, %v45_v20 }
  0xf4   :  { %126 = vpow2.f32 %v46_v21 }
  0xf5   :  { %128 = vpow2.f32 %v37_v24 }
  0xf7   :  { %v69_v31 = vld [vmem:[#allocation4] sm:$0xff] }
  0xf8   :  { %v71_v34 = vsub.f32 %v69_v31, %v70_v33 }
  0xfa   :  { %v127_v22 = vpop.eup %126 }
  0xfb   :  { %v48_v23 = vsel %vm30_vm0, %v127_v22, 0.0  ;;  %v129_v25 = vpop.eup %128 }
  0xfc   :  { %49 = vadd.xlane.f32.xlu1 %v48_v23  ;;  %v39_v27 = vmul.f32 %v129_v25, %v35_v26 }
 0x16f   :  { %v50_v28 = vpop.xlane.xlu1 %49 }
 0x170   :  { %v51_v29 = vadd.f32 %v50_v28, %v39_v27 }
 0x172   :  { %53 = vst.msk [vmem:[#allocation3] sm:$0xff] %vm16_vm2, %v51_v29 }
 0x179   :  { %v72_v30 = vld [vmem:[#allocation3] sm:$0xff] }
 0x17a   :  { %130 = vlog2.f32 %v72_v30 }
 0x180   :  { %v131_v32 = vpop.eup %130 }
 0x181   :  { %v74_v35 = vmul.f32 0.6931472, %v131_v32 }
 0x183   :  { %v75_v36 = vsub.f32 %v71_v34, %v74_v35 }
 0x185   :  { %v76_v37 = vmul.f32 1.442695, %v75_v36  ;;  %v79_v40 = vsub.f32 0.0, %v75_v36 }
 0x187   :  { %132 = vpow2.f32 %v76_v37 }
 0x18d   :  { %v133_v38 = vpop.eup %132 }
 0x18e   :  { %v78_v39 = vsub.f32 1.0, %v133_v38 }
 0x190   :  { %v80_v41 = vadd.f32 1.0, %v78_v39 }
 0x192   :  { %v81_v42 = vmul.f32 %v80_v41, %v79_v40 }
 0x194   :  { %v89_v43 = vsel %vm16_vm2, %v81_v42, 0.0 }
 0x195   :  { %90 = vadd.xlane.f32.xlu2 %v89_v43 }
 0x208   :  { %v91_v44 = vpop.xlane.xlu2 %90 }
 0x209   :  { %v92_v45 = vrot.slane %v91_v44, 4 }
 0x20b   :  { %v93_v46 = vadd.f32 %v92_v45, %v91_v44 }
 0x20d   :  { %v94_v47 = vrot.slane %v93_v46, 2 }
 0x20f   :  { %v95_v48 = vadd.f32 %v94_v47, %v93_v46 }
 0x211   :  { %v96_v49 = vrot.slane %v95_v48, 1 }
 0x213   :  { %v97_v50 = vadd.f32 %v96_v49, %v95_v48 }
 0x215   :  { %118 = vpush %v97_v50 }
 0x246   :  { %s119_s16 = spop %118 }
 0x247   :  { %v99_v51 = vstv %s119_s16 }
 0x248   :  { %101 = vst.msk [vmem:[#allocation5] sm:$0x1] %vm100_vm4, %v99_v51 }
 0x249   :  { %112 = dma.vmem_to_hbm [thread:$0]  %s108_s1, 16, %s110_s15, [#allocation6]  }
 0x24a   :  { %158 = dma.done.wait [#allocation6], 16  }
 0x24b   :  { %159 = vsyncadd [#allocation6], 4294967280 }
 0x24c   :  { %117 = vsyncpa [#allocation6], 1 }

</bundles_post_ra>
